<compile_context>
chip_gen: v7x
topology: tpu7x:2x2x1
jax: 0.10.0
libtpu: 0.0.40
codegen_flags: <defaults>
</compile_context>

<pallas_src>
import functools

import jax
import jax.numpy as jnp
from jax.experimental import pallas as pl
from jax.experimental.pallas import tpu as pltpu


_NEG = -1e30  # finite "-inf" for padded vocab columns (avoids 0 * inf = NaN in the matmul)


def _round_up(x, m):
    return (x + m - 1) // m * m


def _pick_tile_n(n_rows, vp):
    """Pick the N-axis tile so double-buffered in/out blocks stay well inside the
    scoped-VMEM default on every TPU generation (v7x has only 64 MiB total VMEM)."""
    tn = 1024
    # ~4 live (TN, VP) f32 slabs (double-buffered output + in-kernel temporaries);
    # keep them under ~8 MiB so there is plenty of headroom everywhere.
    while tn > 8 and 4 * tn * vp * 4 > (8 << 20):
        tn //= 2
    return max(8, min(tn, _round_up(n_rows, 8)))


def _logits_kernel(idx_ref, table_ref, logits_ref):
    # idx_ref:    (TN, 1)  int32 token ids
    # table_ref:  (VP, VP) f32 padded embedding table (resident across the grid)
    # logits_ref: (TN, VP) f32 lane-dense output tile
    tn, vp = logits_ref.shape
    col = jax.lax.broadcasted_iota(jnp.int32, (tn, vp), 1)
    onehot = (col == idx_ref[...]).astype(jnp.float32)
    logits_ref[...] = jnp.dot(onehot, table_ref[...],
                              preferred_element_type=jnp.float32)


def _loss_kernel(idx_ref, tgt_ref, table_ref, logits_ref, loss_ref, *, n_valid):
    # idx_ref/tgt_ref: (TN, 1) int32
    # table_ref:       (VP, VP) f32 (padded cols = -1e30)
    # logits_ref:      (TN, VP) f32
    # loss_ref:        (TN, 1)  f32 per-row CE (padded rows -> 0)
    tn, vp = logits_ref.shape
    col = jax.lax.broadcasted_iota(jnp.int32, (tn, vp), 1)

    # Embedding gather as one-hot @ table on the MXU (exact).
    onehot = (col == idx_ref[...]).astype(jnp.float32)
    logits = jnp.dot(onehot, table_ref[...], preferred_element_type=jnp.float32)
    logits_ref[...] = logits

    # Stable per-row cross entropy: logsumexp(logits) - logits[target].
    # Padded columns are -1e30 -> exp underflows to exactly 0, no masking needed.
    m = jnp.max(logits, axis=-1, keepdims=True)
    lse = m + jnp.log(jnp.sum(jnp.exp(logits - m), axis=-1, keepdims=True))
    tgt_logit = jnp.sum(jnp.where(col == tgt_ref[...], logits, 0.0),
                        axis=-1, keepdims=True)

    # Mask rows past the true N (ragged last tile contributes 0 to the sum).
    row = jax.lax.broadcasted_iota(jnp.int32, (tn, 1), 0) + pl.program_id(0) * tn
    loss_ref[...] = jnp.where(row < n_valid, lse - tgt_logit, 0.0)


def bigram_forward(idx, table, targets=None):
    """Pallas implementation of BigramLanguageModel.forward.

    Returns (logits, None) with logits (B, T, V) when targets is None,
    else (logits, loss) with logits (B*T, V) and scalar mean CE loss
    (matching the PyTorch module's .view semantics).
    """
    B, T = idx.shape
    V = table.shape[0]
    N = B * T

    VP = _round_up(max(V, 128), 128)          # lane-dense vocab dim
    TN = _pick_tile_n(N, VP)                  # N-axis tile (multiple of 8)
    N_pad = _round_up(N, TN)
    num_tiles = N_pad // TN

    idx_flat = jnp.zeros((N_pad, 1), jnp.int32).at[:N, 0].set(
        idx.reshape(N).astype(jnp.int32))
    table_pad = jnp.full((VP, VP), _NEG, jnp.float32).at[:V, :V].set(
        table.astype(jnp.float32))

    compiler_params = pltpu.CompilerParams(dimension_semantics=("parallel",))

    if targets is None:
        cost = pl.CostEstimate(
            flops=2 * N_pad * VP * VP + 2 * N_pad * VP,
            transcendentals=0,
            bytes_accessed=N_pad * VP * 4 + VP * VP * 4 + N_pad * 4)
        logits_pad = pl.pallas_call(
            _logits_kernel,
            out_shape=jax.ShapeDtypeStruct((N_pad, VP), jnp.float32),
            grid=(num_tiles,),
            in_specs=[
                pl.BlockSpec((TN, 1), lambda i: (i, 0)),
                pl.BlockSpec((VP, VP), lambda i: (0, 0)),
            ],
            out_specs=pl.BlockSpec((TN, VP), lambda i: (i, 0)),
            compiler_params=compiler_params,
            cost_estimate=cost,
        )(idx_flat, table_pad)
        return logits_pad[:N, :V].reshape(B, T, V), None

    tgt_flat = jnp.zeros((N_pad, 1), jnp.int32).at[:N, 0].set(
        targets.reshape(N).astype(jnp.int32))

    cost = pl.CostEstimate(
        flops=2 * N_pad * VP * VP + 8 * N_pad * VP,
        transcendentals=N_pad * VP + N_pad,
        bytes_accessed=N_pad * VP * 4 + VP * VP * 4 + 3 * N_pad * 4)

    logits_pad, loss_rows = pl.pallas_call(
        functools.partial(_loss_kernel, n_valid=N),
        out_shape=(
            jax.ShapeDtypeStruct((N_pad, VP), jnp.float32),
            jax.ShapeDtypeStruct((N_pad, 1), jnp.float32),
        ),
        grid=(num_tiles,),
        in_specs=[
            pl.BlockSpec((TN, 1), lambda i: (i, 0)),
            pl.BlockSpec((TN, 1), lambda i: (i, 0)),
            pl.BlockSpec((VP, VP), lambda i: (0, 0)),
        ],
        out_specs=(
            pl.BlockSpec((TN, VP), lambda i: (i, 0)),
            pl.BlockSpec((TN, 1), lambda i: (i, 0)),
        ),
        compiler_params=compiler_params,
        cost_estimate=cost,
    )(idx_flat, tgt_flat, table_pad)

    loss = jnp.sum(loss_rows) / N
    logits = logits_pad[:N, :V]               # matches PyTorch's (B*T, C) view
    return logits, loss


if __name__ == "__main__":
    # Synthetic vocab (the PyTorch script derived it from a JSON corpus;
    # here we pick a fixed deterministic size).
    # TODO(synk): read_json_songs_to_str / corpus-derived vocab has no in-kernel
    # equivalent; vocab_size is fixed in-script.
    vocab_size = 64
    B, T = 2, 8

    key = jax.random.PRNGKey(0)
    k_table, k_idx, k_tgt = jax.random.split(key, 3)

    # nn.Embedding default init ~ N(0, 1); deterministic synthetic weights.
    table = jax.random.normal(k_table, (vocab_size, vocab_size), jnp.float32)
    idx = jax.random.randint(k_idx, (B, T), 0, vocab_size, jnp.int32)
    targets = jax.random.randint(k_tgt, (B, T), 0, vocab_size, jnp.int32)

    # Training-style call (logits + loss) and inference-style call (no CE work).
    logits, loss = bigram_forward(idx, table, targets)
    logits_inf, loss_inf = bigram_forward(idx, table, None)
    jax.block_until_ready((logits, loss, logits_inf))

    # Pure-JAX reference check.
    ref_logits = table[idx]                                    # (B, T, V)
    flat = ref_logits.reshape(B * T, vocab_size)
    tgt = targets.reshape(B * T)
    lse = jax.scipy.special.logsumexp(flat, axis=-1)
    ref_loss = jnp.mean(lse - flat[jnp.arange(B * T), tgt])

    assert logits.shape == (B * T, vocab_size)
    assert jnp.allclose(logits, flat, atol=1e-5), "logits mismatch"
    assert logits_inf.shape == (B, T, vocab_size)
    assert jnp.allclose(logits_inf, ref_logits, atol=1e-5), "inference logits mismatch"
    assert loss_inf is None
    assert jnp.allclose(loss, ref_loss, atol=1e-5), "loss mismatch"

    print("KERNEL_OK")
</pallas_src>

<mosaic_0001>
module attributes {stable_mosaic.version = 11 : i64} {
  func.func @_loss_kernel(%arg0: i32, %arg1: memref<16x1xi32, #tpu.memory_space<vmem>>, %arg2: memref<16x1xi32, #tpu.memory_space<vmem>>, %arg3: memref<128x128xf32, #tpu.memory_space<vmem>>, %arg4: memref<16x128xf32, #tpu.memory_space<vmem>>, %arg5: memref<16x1xf32, #tpu.memory_space<vmem>>) attributes {dimension_semantics = [#tpu.dimension_semantics<parallel>], iteration_bounds = array<i64: 1>, scalar_prefetch = 0 : i64, scratch_operands = 0 : i64, tpu.core_type = #tpu.core_type<tc>, window_params = [{transform_indices = @transform_0, window_bounds = array<i64: 16, 1>}, {transform_indices = @transform_1, window_bounds = array<i64: 16, 1>}, {pipeline_mode = #tpu.pipeline_mode<synchronous>, transform_indices = @transform_2, window_bounds = array<i64: 128, 128>}, {transform_indices = @transform_3, window_bounds = array<i64: 16, 128>}, {transform_indices = @transform_4, window_bounds = array<i64: 16, 1>}]} {
    %0 = tpu.iota {dimensions = array<i32: 1>} : vector<16x128xi32>
    %c0 = arith.constant 0 : index
    %c0_0 = arith.constant 0 : index
    %1 = vector.load %arg1[%c0, %c0_0] : memref<16x1xi32, #tpu.memory_space<vmem>>, vector<16x1xi32>
    %2 = vector.broadcast %1 : vector<16x1xi32> to vector<16x128xi32>
    %3 = arith.cmpi eq, %0, %2 : vector<16x128xi32>
    %4 = arith.extui %3 : vector<16x128xi1> to vector<16x128xi32>
    %5 = arith.sitofp %4 : vector<16x128xi32> to vector<16x128xf32>
    %c0_1 = arith.constant 0 : index
    %c0_2 = arith.constant 0 : index
    %6 = vector.load %arg3[%c0_1, %c0_2] : memref<128x128xf32, #tpu.memory_space<vmem>>, vector<128x128xf32>
    %cst = arith.constant dense<0.000000e+00> : vector<16x128xf32>
    %7 = tpu.matmul %5, %6, %cst {dimension_numbers = #tpu.dot_dimension_numbers<[1], [0], [0], [1], [0, 0, 1, 1], [], []>} : vector<16x128xf32>, vector<128x128xf32>, vector<16x128xf32> -> vector<16x128xf32>
    %c0_3 = arith.constant 0 : index
    %c0_4 = arith.constant 0 : index
    %8 = vector.load %arg4[%c0_3, %c0_4] : memref<16x128xf32, #tpu.memory_space<vmem>>, vector<16x128xf32>
    tpu.vector_store %arg4[%c0_3, %c0_4], %7 {strides = array<i32>} : memref<16x128xf32, #tpu.memory_space<vmem>>, vector<16x128xf32>,
    %cst_5 = arith.constant dense<0xFF800000> : vector<16xf32>
    %9 = vector.multi_reduction <maximumf>, %7, %cst_5 [1] : vector<16x128xf32> to vector<16xf32>
    %10 = vector.shape_cast %9 : vector<16xf32> to vector<16x1xf32>
    %11 = vector.broadcast %10 : vector<16x1xf32> to vector<16x128xf32>
    %12 = arith.subf %7, %11 : vector<16x128xf32>
    %13 = math.exp %12 : vector<16x128xf32>
    %cst_6 = arith.constant dense<0.000000e+00> : vector<16xf32>
    %14 = vector.multi_reduction <add>, %13, %cst_6 [1] : vector<16x128xf32> to vector<16xf32>
    %15 = vector.shape_cast %14 : vector<16xf32> to vector<16x1xf32>
    %16 = math.log %15 : vector<16x1xf32>
    %17 = arith.addf %10, %16 : vector<16x1xf32>
    %c0_7 = arith.constant 0 : index
    %c0_8 = arith.constant 0 : index
    %18 = vector.load %arg2[%c0_7, %c0_8] : memref<16x1xi32, #tpu.memory_space<vmem>>, vector<16x1xi32>
    %19 = vector.broadcast %18 : vector<16x1xi32> to vector<16x128xi32>
    %20 = arith.cmpi eq, %0, %19 : vector<16x128xi32>
    %cst_9 = arith.constant 0.000000e+00 : f32
    %21 = vector.broadcast %cst_9 : f32 to vector<16x128xf32>
    %22 = arith.select %20, %7, %21 : vector<16x128xi1>, vector<16x128xf32>
    %cst_10 = arith.constant dense<0.000000e+00> : vector<16xf32>
    %23 = vector.multi_reduction <add>, %22, %cst_10 [1] : vector<16x128xf32> to vector<16xf32>
    %24 = vector.shape_cast %23 : vector<16xf32> to vector<16x1xf32>
    %25 = tpu.iota {dimensions = array<i32: 0>} : vector<16x1xi32>
    %c16_i32 = arith.constant 16 : i32
    %26 = arith.muli %arg0, %c16_i32 : i32
    %27 = vector.broadcast %26 : i32 to vector<16x1xi32>
    %28 = arith.addi %25, %27 : vector<16x1xi32>
    %c16_i32_11 = arith.constant 16 : i32
    %29 = vector.broadcast %c16_i32_11 : i32 to vector<16x1xi32>
    %30 = arith.cmpi slt, %28, %29 : vector<16x1xi32>
    %31 = arith.subf %17, %24 : vector<16x1xf32>
    %cst_12 = arith.constant 0.000000e+00 : f32
    %32 = vector.broadcast %cst_12 : f32 to vector<16x1xf32>
    %33 = arith.select %30, %31, %32 : vector<16x1xi1>, vector<16x1xf32>
    %c0_13 = arith.constant 0 : index
    %c0_14 = arith.constant 0 : index
    %34 = vector.load %arg5[%c0_13, %c0_14] : memref<16x1xf32, #tpu.memory_space<vmem>>, vector<16x1xf32>
    tpu.vector_store %arg5[%c0_13, %c0_14], %33 {strides = array<i32>} : memref<16x1xf32, #tpu.memory_space<vmem>>, vector<16x1xf32>,
    return
  }
  func.func @transform_0(%arg0: i32) -> (i32, i32) {
    %c0_i32 = arith.constant 0 : i32
    %c0_i32_0 = arith.constant 0 : i32
    return %arg0, %c0_i32 : i32, i32
  }
  func.func @transform_1(%arg0: i32) -> (i32, i32) {
    %c0_i32 = arith.constant 0 : i32
    %c0_i32_0 = arith.constant 0 : i32
    return %arg0, %c0_i32 : i32, i32
  }
  func.func @transform_2(%arg0: i32) -> (i32, i32) {
    %c0_i32 = arith.constant 0 : i32
    %c0_i32_0 = arith.constant 0 : i32
    %c0_i32_1 = arith.constant 0 : i32
    return %c0_i32, %c0_i32_0 : i32, i32
  }
  func.func @transform_3(%arg0: i32) -> (i32, i32) {
    %c0_i32 = arith.constant 0 : i32
    %c0_i32_0 = arith.constant 0 : i32
    return %arg0, %c0_i32 : i32, i32
  }
  func.func @transform_4(%arg0: i32) -> (i32, i32) {
    %c0_i32 = arith.constant 0 : i32
    %c0_i32_0 = arith.constant 0 : i32
    return %arg0, %c0_i32 : i32, i32
  }
}

</mosaic_0001>

<bundles_post_ra>
// kernel: tpu_custom_call.1
= control target key start
LH: loop header
LB: loop body
LE: loop exit
PB: predicated region body
PF: predicated region fallthrough
CT: control target
= control target key end

     0   :  { %10 = vsyncpa [#allocation3], 0  ;;  %s445_s0 = inlined_call_operand.vmem [shape: s32[16,1], index: 0, kind: input, shape index: {}]   ;;  %s446_s1 = inlined_call_operand.vmem [shape: s32[16,1], index: 1, kind: input, shape index: {}]   ;;  %s447_s2 = inlined_call_operand.hbm [shape: f32[128,128], index: 2, kind: input, shape index: {}]   ;;  %s448_s3 = inlined_call_operand.hbm [shape: f32[16,128], index: 3, kind: output, shape index: {0}]   ;;  %s449_s4 = inlined_call_operand.vmem [shape: f32[16,1], index: 4, kind: output, shape index: {1}]  }
   0x1   :  { %11 = vsyncpa [#allocation4], 0  ;;  %s366_s15 = smov [#allocation2]   ;;  %s318_s19 = scalar_lea.hbm %s447_s2, 2048 }
   0x2   :  { %s21_s16 = sshll.u32 %s366_s15, 4  ;;  %p319_p0 = scmp.ne.s32.totalorder %s447_s2, %s318_s19  ;;  %s22_s16 = int_to_ptr.vmem [resolvable:$true] %s21_s16 }
   0x3   :  { %p322_p1 = scmp.lt.u32.totalorder %s318_s19, %s447_s2 }
   0x5   :  { %p324_p2 = pnand %p322_p1, %p319_p0 }
   0x7   :  { %327 = shalt.err (!%p324_p2)
}
   0x8   :  { %s328_s24 = scalar_lea.vmem %s22_s16, 2048  ;;  %p333_p4 = scmp.lt.s32.totalorder %s22_s16, %s22_s16 }
   0x9   :  { %p329_p3 = scmp.ne.s32.totalorder %s22_s16, %s328_s24  ;;  %p334_p5 = scmp.lt.s32.totalorder %s328_s24, %s328_s24 }
   0xb   :  { %p335_p6 = por %p334_p5, %p333_p4 }
   0xd   :  { %p336_p7 = pnand %p335_p6, %p329_p3 }
   0xf   :  { %339 = shalt.err (!%p336_p7)
}
  0x10   :  { %s367_s25 = smov 128   ;;  %s368_s26 = smov 8  }
  0x11   :  { %27 = dma.hbm_to_vmem [thread:$0]  %s447_s2, 2048, %s22_s16, [#allocation3], %s367_s25, %s367_s25, %s368_s26  }
  0x12   :  { %362 = dma.done.wait [#allocation3], 2048  }
  0x13   :  { %363 = vsyncadd [#allocation3], 4294965248  ;;  %v369_v0 = vmov 0   ;;  %v33_v1 = vld [vmem:[%s445_s0] sm:$0xff]  ;;  %v48_v3 = vld [vmem:[#allocation2 + $0x8] sm:$0xff]  ;;  %v31_v28 = vlaneseq  ;;  %v370_v31 = vmov 1.0  }
  0x14   :  { %308 = vset.pattern.permute.xlu0 %v369_v0  ;;  %309 = vset.pattern.permute.xlu1 %v369_v0  ;;  %v47_v2 = vld [vmem:[#allocation2] sm:$0xff]  ;;  %v49_v4 = vld [vmem:[#allocation2 + $0x10] sm:$0xff]  ;;  %v34_v5 = vld [vmem:[%s445_s0 + $0x8] sm:$0xff] }
  0x15   :  { %36 = vperm.xlu0 %308, %v33_v1   ;;  %v270_v6 = vpack.c.bf16 %v48_v3, %v47_v2  ;;  %v50_v7 = vld [vmem:[#allocation2 + $0x18] sm:$0xff]  ;;  %v51_v9 = vld [vmem:[#allocation2 + $0x20] sm:$0xff]  ;;  %v52_v10 = vld [vmem:[#allocation2 + $0x28] sm:$0xff]  ;;  %v32_v29 = vand.u32 127, %v31_v28 }
  0x16   :  { %v274_v8 = vpack.c.bf16 %v50_v7, %v49_v4  ;;  %v160_v11 = vld [vmem:[%s446_s1] sm:$0xff]  ;;  %v278_v12 = vpack.c.bf16 %v52_v10, %v51_v9  ;;  %v53_v13 = vld [vmem:[#allocation2 + $0x30] sm:$0xff]  ;;  %v54_v14 = vld [vmem:[#allocation2 + $0x38] sm:$0xff] }
  0x17   :  { %271 = vmatprep.subr.bf16.mxu0 %v270_v6  ;;  %v282_v15 = vpack.c.bf16 %v54_v14, %v53_v13  ;;  %v55_v16 = vld [vmem:[#allocation2 + $0x40] sm:$0xff]  ;;  %v56_v17 = vld [vmem:[#allocation2 + $0x48] sm:$0xff]  ;;  %v57_v19 = vld [vmem:[#allocation2 + $0x50] sm:$0xff] }
  0x18   :  { %273 = vmatpush3.bf16.msra.mxu0 %v270_v6  ;;  %v286_v18 = vpack.c.bf16 %v56_v17, %v55_v16  ;;  %v58_v20 = vld [vmem:[#allocation2 + $0x58] sm:$0xff]  ;;  %v59_v22 = vld [vmem:[#allocation2 + $0x60] sm:$0xff]  ;;  %v60_v23 = vld [vmem:[#allocation2 + $0x68] sm:$0xff] }
  0x19   :  { %39 = vperm.xlu0 %308, %v34_v5   ;;  %275 = vmatprep.subr.bf16.mxu0 %v274_v8  ;;  %v290_v21 = vpack.c.bf16 %v58_v20, %v57_v19  ;;  %v294_v24 = vpack.c.bf16 %v60_v23, %v59_v22  ;;  %v61_v25 = vld [vmem:[#allocation2 + $0x70] sm:$0xff]  ;;  %v62_v26 = vld [vmem:[#allocation2 + $0x78] sm:$0xff]  ;;  %v161_v35 = vld [vmem:[%s446_s1 + $0x8] sm:$0xff]  ;;  %s371_s1 = smov [#allocation5]  }
  0x1a   :  { %v298_v27 = vpack.c.bf16 %v62_v26, %v61_v25  ;;  %s197_s9 = sshll.u32 %s371_s1, 4  ;;  %s198_s9 = int_to_ptr.vmem [resolvable:$true] %s197_s9 }
  0x1b   :  { %s340_s10 = scalar_lea.vmem %s198_s9, 256  ;;  %p345_p9 = scmp.lt.s32.totalorder %s198_s9, %s198_s9 }
  0x1c   :  { %277 = vmatpush3.bf16.msra.mxu0 %v274_v8  ;;  %p341_p8 = scmp.ne.s32.totalorder %s198_s9, %s340_s10  ;;  %p346_p10 = scmp.lt.s32.totalorder %s340_s10, %s340_s10 }
  0x1d   :  { %163 = vperm.xlu0 %308, %v160_v11   ;;  %279 = vmatprep.subr.bf16.mxu0 %v278_v12 }
  0x1e   :  { %p347_p11 = por %p346_p10, %p345_p9 }
  0x20   :  { %281 = vmatpush3.bf16.msra.mxu0 %v278_v12  ;;  %p348_p12 = pnand %p347_p11, %p341_p8 }
  0x21   :  { %283 = vmatprep.subr.bf16.mxu0 %v282_v15 }
  0x24   :  { %285 = vmatpush3.bf16.msra.mxu0 %v282_v15 }
  0x25   :  { %287 = vmatprep.subr.bf16.mxu0 %v286_v18 }
  0x28   :  { %289 = vmatpush3.bf16.msra.mxu0 %v286_v18 }
  0x29   :  { %291 = vmatprep.subr.bf16.mxu0 %v290_v21 }
  0x2c   :  { %293 = vmatpush3.bf16.msra.mxu0 %v290_v21 }
  0x2d   :  { %295 = vmatprep.subr.bf16.mxu0 %v294_v24 }
  0x30   :  { %297 = vmatpush3.bf16.msra.mxu0 %v294_v24 }
  0x31   :  { %299 = vmatprep.subr.bf16.mxu0 %v298_v27 }
  0x34   :  { %301 = vmatpush3.bf16.msra.mxu0 %v298_v27 }
  0x94   :  { %v37_v30 = vpop.permute.xlu0 %36 }
  0x95   :  { %vm41_vm0 = vcmp.eq.s32.totalorder %v32_v29, %v37_v30 }
  0x96   :  { %267 = vmatprep.mubr.msk.f32.mxu0 %vm41_vm0, %v370_v31 }
  0x98   :  { %v40_v32 = vpop.permute.xlu0 %39 }
  0x99   :  { %vm42_vm1 = vcmp.eq.s32.totalorder %v32_v29, %v40_v32 }
  0x9a   :  { %268 = vmatmul.mubr.msk.f32.vlgmr.msra.gmra.mrb[0].mxu0 %vm42_vm1, %v370_v31 }
  0x9c   :  { %v164_v44 = vpop.permute.xlu0 %163 }
  0x9d   :  { %vm168_vm2 = vcmp.eq.s32.totalorder %v32_v29, %v164_v44 }
 0x16d   :  { %v269_v33 = vpop.f32.mrb[0].mxu0 }
 0x16e   :  { %139 = vst [vmem:[#allocation5 + $0x8] sm:$0xff] %v269_v33  ;;  %142 = vmax.xlane.f32.xlu1 %v269_v33  ;;  %v129_v34 = vpop.f32.mrb[1].mxu0 }
 0x16f   :  { %138 = vst [vmem:[#allocation5] sm:$0xff] %v129_v34  ;;  %v170_v46 = vsel %vm168_vm2, %v129_v34, 0.0 }
 0x172   :  { %140 = vmax.xlane.f32.xlu1 %v129_v34 }
 0x183   :  { %166 = vperm.xlu1 %309, %v161_v35  }
 0x1fb   :  { %v143_v36 = vpop.xlane.xlu1 %142 }
 0x1fc   :  { %v145_v37 = vsub.f32 %v269_v33, %v143_v36 }
 0x1fe   :  { %v148_v38 = vmul.f32 1.442695, %v145_v37 }
 0x1ff   :  { %v141_v39 = vpop.xlane.xlu1 %140 }
 0x200   :  { %310 = vpow2.f32 %v148_v38  ;;  %v144_v40 = vsub.f32 %v129_v34, %v141_v39 }
 0x202   :  { %v146_v41 = vmul.f32 1.442695, %v144_v40 }
 0x203   :  { %v167_v45 = vpop.permute.xlu1 %166 }
 0x204   :  { %312 = vpow2.f32 %v146_v41  ;;  %vm169_vm3 = vcmp.eq.s32.totalorder %v32_v29, %v167_v45 }
 0x205   :  { %v171_v47 = vsel %vm169_vm3, %v269_v33, 0.0 }
 0x20a   :  { %v311_v42 = vpop.eup %310 }
 0x20b   :  { %152 = vadd.xlane.f32.xlu1 %v311_v42 }
 0x20e   :  { %v313_v43 = vpop.eup %312 }
 0x20f   :  { %150 = vadd.xlane.f32.xlu0 %v313_v43 }
 0x213   :  { %172 = vadd.xlane.f32.xlu0 %v170_v46 }
 0x217   :  { %174 = vadd.xlane.f32.xlu0 %v171_v47 }
 0x218   :  { %351 = shalt.err (!%p348_p12)
}
 0x219   :  { %s352_s13 = scalar_lea.hbm %s448_s3, 256 }
 0x21a   :  { %p353_p13 = scmp.ne.s32.totalorder %s448_s3, %s352_s13  ;;  %p356_p0 = scmp.lt.u32.totalorder %s352_s13, %s448_s3 }
 0x21c   :  { %p358_p1 = pnand %p356_p0, %p353_p13 }
 0x21e   :  { %361 = shalt.err (!%p358_p1)
}
 0x21f   :  { %203 = dma.vmem_to_hbm [thread:$0]  %s198_s9, 256, %s448_s3, [#allocation4], %s367_s25, %s367_s25, %s368_s26   ;;  %vm189_vm4 = vcmask 7168  }
 0x298   :  { %v153_v48 = vpop.xlane.xlu1 %152 }
 0x299   :  { %314 = vlog2.f32 %v153_v48 }
 0x29c   :  { %v151_v49 = vpop.xlane.xlu0 %150 }
 0x29d   :  { %316 = vlog2.f32 %v151_v49 }
 0x2a0   :  { %v173_v50 = vpop.xlane.xlu0 %172 }
 0x2a3   :  { %v315_v51 = vpop.eup %314 }
 0x2a4   :  { %v157_v52 = vmul.f32 0.6931472, %v315_v51  ;;  %v175_v55 = vpop.xlane.xlu0 %174 }
 0x2a6   :  { %v159_v53 = vadd.f32 %v157_v52, %v143_v36 }
 0x2a7   :  { %v317_v54 = vpop.eup %316 }
 0x2a8   :  { %v155_v56 = vmul.f32 0.6931472, %v317_v54  ;;  %v186_v57 = vsub.f32 %v159_v53, %v175_v55 }
 0x2aa   :  { %v158_v58 = vadd.f32 %v155_v56, %v141_v39  ;;  %191 = vst.msk [vmem:[%s449_s4 + $0x8] sm:$0xff] %vm189_vm4, %v186_v57 }
 0x2ac   :  { %v185_v59 = vsub.f32 %v158_v58, %v173_v50 }
 0x2ae   :  { %190 = vst.msk [vmem:[%s449_s4] sm:$0xff] %vm189_vm4, %v185_v59 }
 0x2af   :  { %364 = dma.done.wait [#allocation4], 256  }
 0x2b0   :  { %365 = vsyncadd [#allocation4], 4294967040 }
 0x2b1   :  { %211 = vsyncpa [#allocation3], 1 }
 0x2b2   :  { %212 = vsyncpa [#allocation4], 1 }

</bundles_post_ra>
